<compile_context>
chip_gen: v7x
topology: tpu7x:2x2x1
jax: 0.10.0
libtpu: 0.0.40
codegen_flags: <defaults>
</compile_context>

<pallas_src>
import numpy as np
import jax
import jax.numpy as jnp
from jax import lax
from jax.experimental import pallas as pl
from jax.experimental.pallas import tpu as pltpu


def _pick_tile_n(n_rows, T, K, max_tile=512, emis_budget_bytes=24 << 20):
    """Widest lane tile (multiple of 128, <= 512) whose double-buffered emissions
    block fits the VMEM budget; shrink while that would leave the grid at a
    single step (v7x megacore wants >= 2 parallel grid steps)."""
    cap = emis_budget_bytes // max(1, 2 * T * K * 4)
    cap = int(min(max_tile, max(128, (cap // 128) * 128)))
    while cap > 128 and (n_rows + cap - 1) // cap < 2:
        cap -= 128
    return cap


# ----------------------------------------------------------------------------
# Pallas kernel: per-sequence CRF log-likelihood (N on lanes)
# ----------------------------------------------------------------------------
def _crf_llh_kernel(tmax_ref, logits_ref, tags_ref, mask_ref, transT_ref,
                    expTs_ref, cmax_ref, start_ref, end_ref, out_ref):
    # tmax_ref  : (n_blocks,) i32 SMEM  per-block max sequence length (>= 1)
    # logits_ref: (T, K, Nb) f32  emissions, N on lanes
    # tags_ref  : (T, 1, Nb) i32  gold tags (leading-axis indexed, no sublane slice)
    # mask_ref  : (T, 1, Nb) f32  prefix mask
    # transT_ref: (K, K)     f32  transitions transposed: transT[k, j] = trans[j, k]
    # expTs_ref : (K, K)     f32  exp(transT - rowmax(transT))   (precomputed)
    # cmax_ref  : (K, 1)     f32  rowmax(transT)                 (precomputed)
    # start_ref : (K, 1) f32,  end_ref : (K, 1) f32
    # out_ref   : (1, Nb)    f32  per-row log-likelihood (0 for padded rows)
    f32 = jnp.float32
    T, K, Nb = logits_ref.shape
    hi = lax.Precision.HIGHEST   # TODO(synk): sweep HIGH vs HIGHEST at prod T/K

    t_hi = tmax_ref[pl.program_id(0)]            # dynamic serial trip count

    transT = transT_ref[...]
    expTs = expTs_ref[...]
    cmax = cmax_ref[...]
    start_col = start_ref[...]
    end_col = end_ref[...]

    k_iota = lax.broadcasted_iota(jnp.int32, (K, Nb), 0)     # (K, Nb)

    tag0 = tags_ref[0]                           # (1, Nb) int32
    m0 = mask_ref[0]                             # (1, Nb)
    emit0 = logits_ref[0]                        # (K, Nb)
    oh0 = (tag0 == k_iota).astype(f32)           # (K, Nb)
    valid = m0 > 0.0                             # (1, Nb) row-validity gate

    # --------- gold-path numerator: no carried dependence on alpha (separate pass)
    num0 = (jnp.sum(start_col * oh0, axis=0, keepdims=True)
            + jnp.sum(emit0 * oh0, axis=0, keepdims=True) * m0)

    def num_body(t, carry):
        num, oh_prev, last_tag = carry
        tag_t = tags_ref[t]                                        # (1, Nb)
        m_t = mask_ref[t]                                          # (1, Nb)
        oh_cur = (tag_t == k_iota).astype(f32)                     # (K, Nb)
        emit_gold = jnp.sum(logits_ref[t] * oh_cur, axis=0, keepdims=True)
        # trans[prev, :] for every lane via one MXU matmul, then pick the gold column.
        sel = jnp.dot(transT, oh_prev, precision=hi, preferred_element_type=f32)
        trans_gold = jnp.sum(sel * oh_cur, axis=0, keepdims=True)
        num = num + (emit_gold + trans_gold) * m_t
        last_tag = jnp.where(m_t > 0.0, tag_t, last_tag)
        return num, oh_cur, last_tag

    num, _, last_tag = lax.fori_loop(1, t_hi, num_body, (num0, oh0, tag0))
    end_score = jnp.sum(end_col * (last_tag == k_iota).astype(f32),
                        axis=0, keepdims=True)                     # (1, Nb)

    # --------- forward algorithm: scaled-probability carry  (alpha = log(p) + c)
    a0 = start_col + emit0
    c = jnp.max(a0, axis=0, keepdims=True)       # (1, Nb)
    p = jnp.exp(a0 - c)                          # (K, Nb), max_k p == 1

    def fwd_body(t, carry):
        p, c = carry
        m_t = mask_ref[t]                                          # (1, Nb)
        emit = logits_ref[t] + cmax                                # off-chain
        m_e = jnp.max(emit, axis=0, keepdims=True)                 # off-chain
        e_off = jnp.exp(emit - m_e)                                # off-chain EUP
        zs = jnp.dot(expTs, p, precision=hi,
                     preferred_element_type=f32)                   # on-chain MXU
        q = zs * e_off
        s = jnp.maximum(jnp.max(q, axis=0, keepdims=True), 1e-30)  # renormalizer
        r = pl.reciprocal(s, approx=True)
        # Compensating c with -log(r) (not log(s)) keeps alpha exact even though
        # the reciprocal is approximate.
        p_new = q * r
        c_new = c + m_e - jnp.log(r)
        p = jnp.where(m_t > 0.0, p_new, p)                         # NaN-safe gate
        c = jnp.where(m_t > 0.0, c_new, c)
        return p, c

    p, c = lax.fori_loop(1, t_hi, fwd_body, (p, c))

    # --------- log-partition and output
    stops = jnp.log(p) + c + end_col                               # (K, Nb)
    smax = jnp.max(stops, axis=0, keepdims=True)
    logz = jnp.log(jnp.sum(jnp.exp(stops - smax), axis=0, keepdims=True)) + smax

    out_ref[...] = jnp.where(valid, num + end_score - logz, 0.0)   # (1, Nb)


def crf_log_likelihood(a_score, a_gold, a_mask, transitions, start_t, end_t,
                       tile_n=None):
    """Per-sequence CRF log-likelihood via the Pallas kernel. Returns (N, 1)."""
    a_score = np.asarray(a_score, dtype=np.float32)   # host glue (ragged assembly)
    a_gold = np.asarray(a_gold, dtype=np.int32)
    a_mask = np.asarray(a_mask, dtype=np.float32)
    N, T, K = a_score.shape

    if tile_n is None:
        tile_n = _pick_tile_n(N, T, K)
    n_blocks = (N + tile_n - 1) // tile_n
    n_pad = n_blocks * tile_n

    # Length-descending packing so rows in a block have similar lengths; the
    # per-block max length becomes the dynamic serial trip count.
    lens = a_mask.sum(axis=1).astype(np.int32)
    order = np.argsort(-lens, kind="stable")
    inv = np.empty(N, dtype=np.int32)
    inv[order] = np.arange(N, dtype=np.int32)

    # Host-side lane-major assembly: (T, K, N_pad) emissions, (T, 1, N_pad)
    # tags / prefix mask (avoids an extra XLA transpose+pad HBM pass).
    logits_t = np.zeros((T, K, n_pad), np.float32)
    logits_t[:, :, :N] = np.transpose(a_score[order], (1, 2, 0))
    tags_t = np.zeros((T, 1, n_pad), np.int32)
    tags_t[:, 0, :N] = a_gold[order].T
    mask_t = np.zeros((T, 1, n_pad), np.float32)
    mask_t[:, 0, :N] = a_mask[order].T

    lens_pad = np.zeros((n_pad,), np.int32)
    lens_pad[:N] = lens[order]
    tmax = np.maximum(lens_pad.reshape(n_blocks, tile_n).max(axis=1), 1).astype(np.int32)

    # Small CRF parameters (computed once, outside the kernel).
    trans = jnp.asarray(transitions, jnp.float32)                  # (K, K) trans[j, k]
    transT = trans.T                                               # transT[k, j]
    cmax_col = jnp.max(transT, axis=1, keepdims=True)              # (K, 1) overflow guard
    expTs = jnp.exp(transT - cmax_col)                             # (K, K), row max = 1
    start_col = jnp.asarray(start_t, jnp.float32).reshape(K, 1)
    end_col = jnp.asarray(end_t, jnp.float32).reshape(K, 1)

    emis_bytes = 2 * T * K * tile_n * 4                            # double-buffered emissions
    vmem_limit = int(min(48 << 20, max(16 << 20, 2 * emis_bytes + (4 << 20))))

    llh_pad = pl.pallas_call(
        _crf_llh_kernel,
        out_shape=jax.ShapeDtypeStruct((1, n_pad), jnp.float32),
        grid_spec=pltpu.PrefetchScalarGridSpec(
            num_scalar_prefetch=1,
            grid=(n_blocks,),
            in_specs=[
                pl.BlockSpec((T, K, tile_n), lambda i, tm: (0, 0, i)),   # emissions
                pl.BlockSpec((T, 1, tile_n), lambda i, tm: (0, 0, i)),   # gold tags
                pl.BlockSpec((T, 1, tile_n), lambda i, tm: (0, 0, i)),   # prefix mask
                pl.BlockSpec((K, K), lambda i, tm: (0, 0)),              # trans^T
                pl.BlockSpec((K, K), lambda i, tm: (0, 0)),              # exp(trans^T - cmax)
                pl.BlockSpec((K, 1), lambda i, tm: (0, 0)),              # cmax
                pl.BlockSpec((K, 1), lambda i, tm: (0, 0)),              # start
                pl.BlockSpec((K, 1), lambda i, tm: (0, 0)),              # end
            ],
            out_specs=pl.BlockSpec((1, tile_n), lambda i, tm: (0, i)),   # lane-dense llh
        ),
        compiler_params=pltpu.CompilerParams(
            dimension_semantics=("parallel",),
            vmem_limit_bytes=vmem_limit),
    )(tmax, logits_t, tags_t, mask_t, transT, expTs, cmax_col, start_col, end_col)

    llh = llh_pad[0, :N][inv]                       # undo the length sort
    return llh.reshape(N, 1)


# ----------------------------------------------------------------------------
# Glue: reproduce CRFLoss.forward (is_train=True, use_gold_predicate=1)
# ----------------------------------------------------------------------------
def _assemble_crf_inputs(score, v_label, v_l, role_label, orig_l):
    score = np.asarray(score)
    v_label = np.asarray(v_label)
    v_l = np.asarray(v_l)
    role_label = np.asarray(role_label)
    orig_l = np.asarray(orig_l)

    batch_l = score.shape[0]
    max_orig_l = int(orig_l.max())

    a_score, a_gold, a_mask = [], [], []
    for i in range(batch_l):
        n_v = int(v_l[i])
        vi = v_label[i, :n_v]
        a_score.append(score[i][vi][:, :max_orig_l, :])                 # (n_v, max_orig_l, K)
        g = np.zeros((n_v, max_orig_l), dtype=np.int32)
        g[:, : int(orig_l[i])] = role_label[i, :n_v, : int(orig_l[i])]
        a_gold.append(g)
        m = np.zeros((n_v, max_orig_l), dtype=np.float32)
        m[:, : int(orig_l[i])] = 1.0
        a_mask.append(m)

    a_score = np.concatenate(a_score, axis=0).astype(np.float32)
    a_gold = np.concatenate(a_gold, axis=0).astype(np.int32)
    a_mask = np.concatenate(a_mask, axis=0).astype(np.float32)
    return a_score, a_gold, a_mask, max_orig_l


def crf_loss_forward(log_pa, score, v_label, v_l, role_label, orig_l, params):
    a_score, a_gold, a_mask, max_orig_l = _assemble_crf_inputs(
        score, v_label, v_l, role_label, orig_l)

    llh = crf_log_likelihood(a_score, a_gold, a_mask,
                             params["transitions"], params["start"], params["end"])
    # CRF loss = negative log-likelihood summed over all (predicate, sequence) rows.
    loss = -jnp.sum(llh)

    # Training-path pred_idx: argmax of log_pa over the label axis (glue).
    pred_idx = jnp.argmax(
        jnp.asarray(log_pa)[:, :max_orig_l, :max_orig_l], axis=-1).astype(jnp.int32)

    # use_gold_predicate == 1  ->  normalizer = total number of predicates
    num_prop = float(np.sum(np.asarray(v_l)))
    # TODO(synk): quick-acc / analyze / confusion-matrix bookkeeping is host-side
    #             Python state in the original module and is not reproduced here.
    return loss / num_prop, pred_idx, llh, (a_score, a_gold, a_mask)


# ----------------------------------------------------------------------------
# Pure numpy reference for the CRF log-likelihood (for correctness check)
# ----------------------------------------------------------------------------
def _logsumexp_np(x, axis=None):
    m = np.max(x, axis=axis, keepdims=True)
    return (np.log(np.sum(np.exp(x - m), axis=axis, keepdims=True)) + m).squeeze(axis)


def _crf_llh_ref(logits, tags, mask, trans, start, end):
    logits, tags, mask = np.asarray(logits), np.asarray(tags), np.asarray(mask)
    trans, start, end = np.asarray(trans), np.asarray(start), np.asarray(end)
    N, T, K = logits.shape
    out = np.zeros((N, 1), np.float32)
    for n in range(N):
        L = int(mask[n].sum())
        num = start[tags[n, 0]] + logits[n, 0, tags[n, 0]]
        for t in range(1, L):
            num += trans[tags[n, t - 1], tags[n, t]] + logits[n, t, tags[n, t]]
        num += end[tags[n, L - 1]]
        alpha = start + logits[n, 0]
        for t in range(1, L):
            alpha = _logsumexp_np(alpha[:, None] + trans + logits[n, t][None, :], axis=0)
        denom = _logsumexp_np(alpha + end, axis=0)
        out[n, 0] = num - denom
    return out


# ----------------------------------------------------------------------------
# Demo
# ----------------------------------------------------------------------------
if __name__ == "__main__":
    key = jax.random.PRNGKey(0)
    batch_l, source_l, K = 2, 16, 8      # K = opt.num_label
    max_num_v = 4

    orig_l = np.array([12, 16], dtype=np.int32)          # self.shared.orig_seq_l
    v_l = np.array([2, 3], dtype=np.int32)
    v_label = np.zeros((batch_l, max_num_v), dtype=np.int32)
    v_label[0, :2] = [1, 5]
    v_label[1, :3] = [2, 7, 10]

    k1, k2, k3 = jax.random.split(key, 3)
    score = jax.random.normal(k1, (batch_l, source_l, source_l, K), jnp.float32)
    log_pa = jax.random.normal(k2, (batch_l, source_l, source_l, K), jnp.float32)
    role_label = jax.random.randint(k3, (batch_l, max_num_v, source_l), 0, K).astype(jnp.int32)

    # Deterministic CRF parameters (ConditionalRandomField init shapes: (K,K), (K,), (K,)).
    transitions = ((jnp.arange(K * K, dtype=jnp.float32).reshape(K, K) / (K * K)) - 0.5) * 0.2
    start_t = jnp.linspace(-0.1, 0.1, K, dtype=jnp.float32)
    end_t = jnp.linspace(0.1, -0.1, K, dtype=jnp.float32)
    params = dict(transitions=transitions, start=start_t, end=end_t)

    loss, pred_idx, llh, (a_score, a_gold, a_mask) = crf_loss_forward(
        log_pa, score, v_label, v_l, role_label, orig_l, params)
    jax.block_until_ready((loss, pred_idx, llh))

    # Correctness check of the kernel against the numpy CRF reference.
    llh_ref = _crf_llh_ref(a_score, a_gold, a_mask, transitions, start_t, end_t)
    np.testing.assert_allclose(np.asarray(llh), llh_ref, rtol=1e-3, atol=1e-2)
    assert pred_idx.shape == (batch_l, int(orig_l.max()), int(orig_l.max()))
    assert np.isfinite(float(loss))

    print("KERNEL_OK")
</pallas_src>

<mosaic_0001>
module attributes {stable_mosaic.version = 11 : i64} {
  func.func @_crf_llh_kernel(%arg0: i32, %arg1: memref<1xi32, #tpu.memory_space<smem>>, %arg2: memref<16x8x128xf32, #tpu.memory_space<vmem>>, %arg3: memref<16x1x128xi32, #tpu.memory_space<vmem>>, %arg4: memref<16x1x128xf32, #tpu.memory_space<vmem>>, %arg5: memref<8x8xf32, #tpu.memory_space<vmem>>, %arg6: memref<8x8xf32, #tpu.memory_space<vmem>>, %arg7: memref<8x1xf32, #tpu.memory_space<vmem>>, %arg8: memref<8x1xf32, #tpu.memory_space<vmem>>, %arg9: memref<8x1xf32, #tpu.memory_space<vmem>>, %arg10: memref<1x128xf32, #tpu.memory_space<vmem>>) attributes {dimension_semantics = [#tpu.dimension_semantics<parallel>], iteration_bounds = array<i64: 1>, scalar_prefetch = 1 : i64, scratch_operands = 0 : i64, tpu.core_type = #tpu.core_type<tc>, window_params = [{transform_indices = @transform_0, window_bounds = array<i64: 16, 8, 128>}, {transform_indices = @transform_1, window_bounds = array<i64: 16, 1, 128>}, {transform_indices = @transform_2, window_bounds = array<i64: 16, 1, 128>}, {pipeline_mode = #tpu.pipeline_mode<synchronous>, transform_indices = @transform_3, window_bounds = array<i64: 8, 8>}, {pipeline_mode = #tpu.pipeline_mode<synchronous>, transform_indices = @transform_4, window_bounds = array<i64: 8, 8>}, {pipeline_mode = #tpu.pipeline_mode<synchronous>, transform_indices = @transform_5, window_bounds = array<i64: 8, 1>}, {pipeline_mode = #tpu.pipeline_mode<synchronous>, transform_indices = @transform_6, window_bounds = array<i64: 8, 1>}, {pipeline_mode = #tpu.pipeline_mode<synchronous>, transform_indices = @transform_7, window_bounds = array<i64: 8, 1>}, {transform_indices = @transform_8, window_bounds = array<i64: 1, 128>}]} {
    %0 = arith.index_cast %arg0 : i32 to index
    %1 = memref.load %arg1[%0] : memref<1xi32, #tpu.memory_space<smem>>
    %c0 = arith.constant 0 : index
    %c0_0 = arith.constant 0 : index
    %2 = vector.load %arg5[%c0, %c0_0] : memref<8x8xf32, #tpu.memory_space<vmem>>, vector<8x8xf32>
    %c0_1 = arith.constant 0 : index
    %c0_2 = arith.constant 0 : index
    %3 = vector.load %arg6[%c0_1, %c0_2] : memref<8x8xf32, #tpu.memory_space<vmem>>, vector<8x8xf32>
    %c0_3 = arith.constant 0 : index
    %c0_4 = arith.constant 0 : index
    %4 = vector.load %arg7[%c0_3, %c0_4] : memref<8x1xf32, #tpu.memory_space<vmem>>, vector<8x1xf32>
    %c0_5 = arith.constant 0 : index
    %c0_6 = arith.constant 0 : index
    %5 = vector.load %arg8[%c0_5, %c0_6] : memref<8x1xf32, #tpu.memory_space<vmem>>, vector<8x1xf32>
    %c0_7 = arith.constant 0 : index
    %c0_8 = arith.constant 0 : index
    %6 = vector.load %arg9[%c0_7, %c0_8] : memref<8x1xf32, #tpu.memory_space<vmem>>, vector<8x1xf32>
    %7 = tpu.iota {dimensions = array<i32: 0>} : vector<8x128xi32>
    %c0_9 = arith.constant 0 : index
    %c0_10 = arith.constant 0 : index
    %c0_11 = arith.constant 0 : index
    %8 = vector.load %arg3[%c0_9, %c0_10, %c0_11] : memref<16x1x128xi32, #tpu.memory_space<vmem>>, vector<1x1x128xi32>
    %9 = vector.shape_cast %8 : vector<1x1x128xi32> to vector<1x128xi32>
    %c0_12 = arith.constant 0 : index
    %c0_13 = arith.constant 0 : index
    %c0_14 = arith.constant 0 : index
    %10 = vector.load %arg4[%c0_12, %c0_13, %c0_14] : memref<16x1x128xf32, #tpu.memory_space<vmem>>, vector<1x1x128xf32>
    %11 = vector.shape_cast %10 : vector<1x1x128xf32> to vector<1x128xf32>
    %c0_15 = arith.constant 0 : index
    %c0_16 = arith.constant 0 : index
    %c0_17 = arith.constant 0 : index
    %12 = vector.load %arg2[%c0_15, %c0_16, %c0_17] : memref<16x8x128xf32, #tpu.memory_space<vmem>>, vector<1x8x128xf32>
    %13 = vector.shape_cast %12 : vector<1x8x128xf32> to vector<8x128xf32>
    %14 = vector.broadcast %9 : vector<1x128xi32> to vector<8x128xi32>
    %15 = arith.cmpi eq, %14, %7 : vector<8x128xi32>
    %16 = arith.extui %15 : vector<8x128xi1> to vector<8x128xi32>
    %17 = arith.sitofp %16 : vector<8x128xi32> to vector<8x128xf32>
    %cst = arith.constant 0.000000e+00 : f32
    %18 = vector.broadcast %cst : f32 to vector<1x128xf32>
    %19 = arith.cmpf ogt, %11, %18 : vector<1x128xf32>
    %20 = vector.broadcast %5 : vector<8x1xf32> to vector<8x128xf32>
    %21 = arith.mulf %20, %17 : vector<8x128xf32>
    %cst_18 = arith.constant dense<0.000000e+00> : vector<128xf32>
    %22 = vector.multi_reduction <add>, %21, %cst_18 [0] : vector<8x128xf32> to vector<128xf32>
    %23 = vector.shape_cast %22 : vector<128xf32> to vector<1x128xf32>
    %24 = arith.mulf %13, %17 : vector<8x128xf32>
    %cst_19 = arith.constant dense<0.000000e+00> : vector<128xf32>
    %25 = vector.multi_reduction <add>, %24, %cst_19 [0] : vector<8x128xf32> to vector<128xf32>
    %26 = vector.shape_cast %25 : vector<128xf32> to vector<1x128xf32>
    %27 = arith.mulf %26, %11 : vector<1x128xf32>
    %28 = arith.addf %23, %27 : vector<1x128xf32>
    %c1_i32 = arith.constant 1 : i32
    %29 = arith.subi %1, %c1_i32 : i32
    %30 = arith.addi %c1_i32, %29 : i32
    %c1_i32_20 = arith.constant 1 : i32
    %31:3 = scf.for %arg11 = %c1_i32 to %30 step %c1_i32_20 iter_args(%arg12 = %28, %arg13 = %17, %arg14 = %9) -> (vector<1x128xf32>, vector<8x128xf32>, vector<1x128xi32>)  : i32 {
      %69 = arith.index_cast %arg11 : i32 to index
      %c0_30 = arith.constant 0 : index
      %c0_31 = arith.constant 0 : index
      %70 = vector.load %arg3[%69, %c0_30, %c0_31] : memref<16x1x128xi32, #tpu.memory_space<vmem>>, vector<1x1x128xi32>
      %71 = vector.shape_cast %70 : vector<1x1x128xi32> to vector<1x128xi32>
      %72 = arith.index_cast %arg11 : i32 to index
      %c0_32 = arith.constant 0 : index
      %c0_33 = arith.constant 0 : index
      %73 = vector.load %arg4[%72, %c0_32, %c0_33] : memref<16x1x128xf32, #tpu.memory_space<vmem>>, vector<1x1x128xf32>
      %74 = vector.shape_cast %73 : vector<1x1x128xf32> to vector<1x128xf32>
      %75 = vector.broadcast %71 : vector<1x128xi32> to vector<8x128xi32>
      %76 = arith.cmpi eq, %75, %7 : vector<8x128xi32>
      %77 = arith.extui %76 : vector<8x128xi1> to vector<8x128xi32>
      %78 = arith.sitofp %77 : vector<8x128xi32> to vector<8x128xf32>
      %79 = arith.index_cast %arg11 : i32 to index
      %c0_34 = arith.constant 0 : index
      %c0_35 = arith.constant 0 : index
      %80 = vector.load %arg2[%79, %c0_34, %c0_35] : memref<16x8x128xf32, #tpu.memory_space<vmem>>, vector<1x8x128xf32>
      %81 = vector.shape_cast %80 : vector<1x8x128xf32> to vector<8x128xf32>
      %82 = arith.mulf %81, %78 : vector<8x128xf32>
      %cst_36 = arith.constant dense<0.000000e+00> : vector<128xf32>
      %83 = vector.multi_reduction <add>, %82, %cst_36 [0] : vector<8x128xf32> to vector<128xf32>
      %84 = vector.shape_cast %83 : vector<128xf32> to vector<1x128xf32>
      %cst_37 = arith.constant dense<0.000000e+00> : vector<8x128xf32>
      %85 = tpu.matmul %2, %arg13, %cst_37 {dimension_numbers = #tpu.dot_dimension_numbers<[1], [0], [0], [1], [0, 0, 1, 1], [], []>, precision = #tpu.contract_precision<fp32>} : vector<8x8xf32>, vector<8x128xf32>, vector<8x128xf32> -> vector<8x128xf32>
      %86 = arith.mulf %85, %78 : vector<8x128xf32>
      %cst_38 = arith.constant dense<0.000000e+00> : vector<128xf32>
      %87 = vector.multi_reduction <add>, %86, %cst_38 [0] : vector<8x128xf32> to vector<128xf32>
      %88 = vector.shape_cast %87 : vector<128xf32> to vector<1x128xf32>
      %89 = arith.addf %84, %88 : vector<1x128xf32>
      %90 = arith.mulf %89, %74 : vector<1x128xf32>
      %91 = arith.addf %arg12, %90 : vector<1x128xf32>
      %cst_39 = arith.constant 0.000000e+00 : f32
      %92 = vector.broadcast %cst_39 : f32 to vector<1x128xf32>
      %93 = arith.cmpf ogt, %74, %92 : vector<1x128xf32>
      %94 = arith.select %93, %71, %arg14 : vector<1x128xi1>, vector<1x128xi32>
      scf.yield %91, %78, %94 : vector<1x128xf32>, vector<8x128xf32>, vector<1x128xi32>
    }
    %32 = vector.broadcast %31#2 : vector<1x128xi32> to vector<8x128xi32>
    %33 = arith.cmpi eq, %32, %7 : vector<8x128xi32>
    %34 = arith.extui %33 : vector<8x128xi1> to vector<8x128xi32>
    %35 = arith.sitofp %34 : vector<8x128xi32> to vector<8x128xf32>
    %36 = vector.broadcast %6 : vector<8x1xf32> to vector<8x128xf32>
    %37 = arith.mulf %36, %35 : vector<8x128xf32>
    %cst_21 = arith.constant dense<0.000000e+00> : vector<128xf32>
    %38 = vector.multi_reduction <add>, %37, %cst_21 [0] : vector<8x128xf32> to vector<128xf32>
    %39 = vector.shape_cast %38 : vector<128xf32> to vector<1x128xf32>
    %40 = vector.broadcast %5 : vector<8x1xf32> to vector<8x128xf32>
    %41 = arith.addf %40, %13 : vector<8x128xf32>
    %cst_22 = arith.constant dense<0xFF800000> : vector<128xf32>
    %42 = vector.multi_reduction <maximumf>, %41, %cst_22 [0] : vector<8x128xf32> to vector<128xf32>
    %43 = vector.shape_cast %42 : vector<128xf32> to vector<1x128xf32>
    %44 = vector.broadcast %43 : vector<1x128xf32> to vector<8x128xf32>
    %45 = arith.subf %41, %44 : vector<8x128xf32>
    %46 = math.exp %45 : vector<8x128xf32>
    %c1_i32_23 = arith.constant 1 : i32
    %47 = arith.subi %1, %c1_i32_23 : i32
    %48 = arith.addi %c1_i32_23, %47 : i32
    %c1_i32_24 = arith.constant 1 : i32
    %49:2 = scf.for %arg11 = %c1_i32_23 to %48 step %c1_i32_24 iter_args(%arg12 = %46, %arg13 = %43) -> (vector<8x128xf32>, vector<1x128xf32>)  : i32 {
      %69 = arith.index_cast %arg11 : i32 to index
      %c0_30 = arith.constant 0 : index
      %c0_31 = arith.constant 0 : index
      %70 = vector.load %arg4[%69, %c0_30, %c0_31] : memref<16x1x128xf32, #tpu.memory_space<vmem>>, vector<1x1x128xf32>
      %71 = vector.shape_cast %70 : vector<1x1x128xf32> to vector<1x128xf32>
      %72 = arith.index_cast %arg11 : i32 to index
      %c0_32 = arith.constant 0 : index
      %c0_33 = arith.constant 0 : index
      %73 = vector.load %arg2[%72, %c0_32, %c0_33] : memref<16x8x128xf32, #tpu.memory_space<vmem>>, vector<1x8x128xf32>
      %74 = vector.shape_cast %73 : vector<1x8x128xf32> to vector<8x128xf32>
      %75 = vector.broadcast %4 : vector<8x1xf32> to vector<8x128xf32>
      %76 = arith.addf %74, %75 : vector<8x128xf32>
      %cst_34 = arith.constant dense<0xFF800000> : vector<128xf32>
      %77 = vector.multi_reduction <maximumf>, %76, %cst_34 [0] : vector<8x128xf32> to vector<128xf32>
      %78 = vector.shape_cast %77 : vector<128xf32> to vector<1x128xf32>
      %79 = vector.broadcast %78 : vector<1x128xf32> to vector<8x128xf32>
      %80 = arith.subf %76, %79 : vector<8x128xf32>
      %81 = math.exp %80 : vector<8x128xf32>
      %cst_35 = arith.constant dense<0.000000e+00> : vector<8x128xf32>
      %82 = tpu.matmul %3, %arg12, %cst_35 {dimension_numbers = #tpu.dot_dimension_numbers<[1], [0], [0], [1], [0, 0, 1, 1], [], []>, precision = #tpu.contract_precision<fp32>} : vector<8x8xf32>, vector<8x128xf32>, vector<8x128xf32> -> vector<8x128xf32>
      %83 = arith.mulf %82, %81 : vector<8x128xf32>
      %cst_36 = arith.constant dense<0xFF800000> : vector<128xf32>
      %84 = vector.multi_reduction <maximumf>, %83, %cst_36 [0] : vector<8x128xf32> to vector<128xf32>
      %85 = vector.shape_cast %84 : vector<128xf32> to vector<1x128xf32>
      %cst_37 = arith.constant 1.000000e-30 : f32
      %86 = vector.broadcast %cst_37 : f32 to vector<1x128xf32>
      %87 = arith.maximumf %85, %86 : vector<1x128xf32>
      %88 = tpu.reciprocal %87 {approx = true} : vector<1x128xf32> -> vector<1x128xf32>
      %89 = vector.broadcast %88 : vector<1x128xf32> to vector<8x128xf32>
      %90 = arith.mulf %83, %89 : vector<8x128xf32>
      %91 = arith.addf %arg13, %78 : vector<1x128xf32>
      %92 = math.log %88 : vector<1x128xf32>
      %93 = arith.subf %91, %92 : vector<1x128xf32>
      %cst_38 = arith.constant 0.000000e+00 : f32
      %94 = vector.broadcast %cst_38 : f32 to vector<1x128xf32>
      %95 = arith.cmpf ogt, %71, %94 : vector<1x128xf32>
      %96 = vector.shape_cast %95 : vector<1x128xi1> to vector<1x128xi1>
      %97 = vector.broadcast %96 : vector<1x128xi1> to vector<8x128xi1>
      %98 = arith.select %97, %90, %arg12 : vector<8x128xi1>, vector<8x128xf32>
      %cst_39 = arith.constant 0.000000e+00 : f32
      %99 = vector.broadcast %cst_39 : f32 to vector<1x128xf32>
      %100 = arith.cmpf ogt, %71, %99 : vector<1x128xf32>
      %101 = arith.select %100, %93, %arg13 : vector<1x128xi1>, vector<1x128xf32>
      scf.yield %98, %101 : vector<8x128xf32>, vector<1x128xf32>
    }
    %50 = math.log %49#0 : vector<8x128xf32>
    %51 = vector.broadcast %49#1 : vector<1x128xf32> to vector<8x128xf32>
    %52 = arith.addf %50, %51 : vector<8x128xf32>
    %53 = vector.broadcast %6 : vector<8x1xf32> to vector<8x128xf32>
    %54 = arith.addf %52, %53 : vector<8x128xf32>
    %cst_25 = arith.constant dense<0xFF800000> : vector<128xf32>
    %55 = vector.multi_reduction <maximumf>, %54, %cst_25 [0] : vector<8x128xf32> to vector<128xf32>
    %56 = vector.shape_cast %55 : vector<128xf32> to vector<1x128xf32>
    %57 = vector.broadcast %56 : vector<1x128xf32> to vector<8x128xf32>
    %58 = arith.subf %54, %57 : vector<8x128xf32>
    %59 = math.exp %58 : vector<8x128xf32>
    %cst_26 = arith.constant dense<0.000000e+00> : vector<128xf32>
    %60 = vector.multi_reduction <add>, %59, %cst_26 [0] : vector<8x128xf32> to vector<128xf32>
    %61 = vector.shape_cast %60 : vector<128xf32> to vector<1x128xf32>
    %62 = math.log %61 : vector<1x128xf32>
    %63 = arith.addf %62, %56 : vector<1x128xf32>
    %64 = arith.addf %31#0, %39 : vector<1x128xf32>
    %65 = arith.subf %64, %63 : vector<1x128xf32>
    %cst_27 = arith.constant 0.000000e+00 : f32
    %66 = vector.broadcast %cst_27 : f32 to vector<1x128xf32>
    %67 = arith.select %19, %65, %66 : vector<1x128xi1>, vector<1x128xf32>
    %c0_28 = arith.constant 0 : index
    %c0_29 = arith.constant 0 : index
    %68 = vector.load %arg10[%c0_28, %c0_29] : memref<1x128xf32, #tpu.memory_space<vmem>>, vector<1x128xf32>
    tpu.vector_store %arg10[%c0_28, %c0_29], %67 {strides = array<i32>} : memref<1x128xf32, #tpu.memory_space<vmem>>, vector<1x128xf32>,
    return
  }
  func.func @transform_0(%arg0: i32, %arg1: memref<1xi32, #tpu.memory_space<smem>>) -> (i32, i32, i32) {
    %c0_i32 = arith.constant 0 : i32
    %c0_i32_0 = arith.constant 0 : i32
    %c0_i32_1 = arith.constant 0 : i32
    return %c0_i32, %c0_i32_0, %arg0 : i32, i32, i32
  }
  func.func @transform_1(%arg0: i32, %arg1: memref<1xi32, #tpu.memory_space<smem>>) -> (i32, i32, i32) {
    %c0_i32 = arith.constant 0 : i32
    %c0_i32_0 = arith.constant 0 : i32
    %c0_i32_1 = arith.constant 0 : i32
    return %c0_i32, %c0_i32_0, %arg0 : i32, i32, i32
  }
  func.func @transform_2(%arg0: i32, %arg1: memref<1xi32, #tpu.memory_space<smem>>) -> (i32, i32, i32) {
    %c0_i32 = arith.constant 0 : i32
    %c0_i32_0 = arith.constant 0 : i32
    %c0_i32_1 = arith.constant 0 : i32
    return %c0_i32, %c0_i32_0, %arg0 : i32, i32, i32
  }
  func.func @transform_3(%arg0: i32, %arg1: memref<1xi32, #tpu.memory_space<smem>>) -> (i32, i32) {
    %c0_i32 = arith.constant 0 : i32
    %c0_i32_0 = arith.constant 0 : i32
    %c0_i32_1 = arith.constant 0 : i32
    return %c0_i32, %c0_i32_0 : i32, i32
  }
  func.func @transform_4(%arg0: i32, %arg1: memref<1xi32, #tpu.memory_space<smem>>) -> (i32, i32) {
    %c0_i32 = arith.constant 0 : i32
    %c0_i32_0 = arith.constant 0 : i32
    %c0_i32_1 = arith.constant 0 : i32
    return %c0_i32, %c0_i32_0 : i32, i32
  }
  func.func @transform_5(%arg0: i32, %arg1: memref<1xi32, #tpu.memory_space<smem>>) -> (i32, i32) {
    %c0_i32 = arith.constant 0 : i32
    %c0_i32_0 = arith.constant 0 : i32
    %c0_i32_1 = arith.constant 0 : i32
    return %c0_i32, %c0_i32_0 : i32, i32
  }
  func.func @transform_6(%arg0: i32, %arg1: memref<1xi32, #tpu.memory_space<smem>>) -> (i32, i32) {
    %c0_i32 = arith.constant 0 : i32
    %c0_i32_0 = arith.constant 0 : i32
    %c0_i32_1 = arith.constant 0 : i32
    return %c0_i32, %c0_i32_0 : i32, i32
  }
  func.func @transform_7(%arg0: i32, %arg1: memref<1xi32, #tpu.memory_space<smem>>) -> (i32, i32) {
    %c0_i32 = arith.constant 0 : i32
    %c0_i32_0 = arith.constant 0 : i32
    %c0_i32_1 = arith.constant 0 : i32
    return %c0_i32, %c0_i32_0 : i32, i32
  }
  func.func @transform_8(%arg0: i32, %arg1: memref<1xi32, #tpu.memory_space<smem>>) -> (i32, i32) {
    %c0_i32 = arith.constant 0 : i32
    %c0_i32_0 = arith.constant 0 : i32
    return %c0_i32, %arg0 : i32, i32
  }
}

</mosaic_0001>

<bundles_post_ra>
// kernel: tpu_custom_call.1
= control target key start
LH: loop header
LB: loop body
LE: loop exit
PB: predicated region body
PF: predicated region fallthrough
CT: control target
= control target key end

     0   :  { %15 = vsyncpa [#allocation5], 0  ;;  %s1876_s0 = inlined_call_operand.<no memory space> [shape: s32[1], index: 0, kind: input, shape index: {}]   ;;  %s1877_s1 = inlined_call_operand.hbm [shape: f32[16,8,128], index: 1, kind: input, shape index: {}]   ;;  %s1878_s2 = inlined_call_operand.vmem [shape: s32[16,1,128], index: 2, kind: input, shape index: {}]   ;;  %s1879_s3 = inlined_call_operand.vmem [shape: f32[16,1,128], index: 3, kind: input, shape index: {}]   ;;  %s1880_s4 = inlined_call_operand.vmem [shape: f32[8,8], index: 4, kind: input, shape index: {}]   ;;  %s1881_s5 = inlined_call_operand.hbm [shape: f32[8,8], index: 5, kind: input, shape index: {}]   ;;  %s1882_s6 = inlined_call_operand.vmem [shape: f32[8,1], index: 6, kind: input, shape index: {}]   ;;  %s1883_s7 = inlined_call_operand.vmem [shape: f32[8,1], index: 7, kind: input, shape index: {}]   ;;  %s1884_s8 = inlined_call_operand.vmem [shape: f32[8,1], index: 8, kind: input, shape index: {}]   ;;  %s1885_s9 = inlined_call_operand.hbm [shape: f32[1,128], index: 9, kind: output, shape index: {}]  }
   0x1   :  { %16 = vsyncpa [#allocation8], 0 }
   0x2   :  { %17 = vsyncpa [#allocation6], 0  ;;  %s1584_s30 = smov [#allocation4]   ;;  %s1424_s13 = scalar_lea.hbm %s1877_s1, 2048 }
   0x3   :  { %s23_s10 = sshll.u32 %s1584_s30, 4  ;;  %p1425_p0 = scmp.ne.s32.totalorder %s1877_s1, %s1424_s13  ;;  %s24_s10 = int_to_ptr.vmem [resolvable:$true] %s23_s10 }
   0x4   :  { %p1428_p1 = scmp.lt.u32.totalorder %s1424_s13, %s1877_s1 }
   0x6   :  { %p1430_p2 = pnand %p1428_p1, %p1425_p0 }
   0x8   :  { %1433 = shalt.err (!%p1430_p2)
}
   0x9   :  { %s1434_s18 = scalar_lea.vmem %s24_s10, 2048  ;;  %p1439_p4 = scmp.lt.s32.totalorder %s24_s10, %s24_s10 }
   0xa   :  { %p1435_p3 = scmp.ne.s32.totalorder %s24_s10, %s1434_s18  ;;  %p1440_p5 = scmp.lt.s32.totalorder %s1434_s18, %s1434_s18 }
   0xc   :  { %p1441_p6 = por %p1440_p5, %p1439_p4 }
   0xe   :  { %p1442_p7 = pnand %p1441_p6, %p1435_p3 }
  0x10   :  { %1445 = shalt.err (!%p1442_p7)
}
  0x11   :  { %s1585_s19 = smov 128   ;;  %s1586_s20 = smov 8  }
  0x12   :  { %29 = dma.hbm_to_vmem [thread:$0]  %s1877_s1, 2048, %s24_s10, [#allocation5], %s1585_s19, %s1585_s19, %s1586_s20  }
  0x13   :  { %s1587_s23 = smov [#allocation7]   ;;  %s1446_s27 = scalar_lea.hbm %s1881_s5, 128 }
  0x14   :  { %s42_s24 = sshll.u32 %s1587_s23, 4  ;;  %p1447_p8 = scmp.ne.s32.totalorder %s1881_s5, %s1446_s27  ;;  %s43_s24 = int_to_ptr.vmem [resolvable:$true] %s42_s24 }
  0x15   :  { %p1450_p9 = scmp.lt.u32.totalorder %s1446_s27, %s1881_s5 }
  0x17   :  { %p1452_p10 = pnand %p1450_p9, %p1447_p8 }
  0x19   :  { %1455 = shalt.err (!%p1452_p10)
}
  0x1a   :  { %s1456_s12 = scalar_lea.vmem %s43_s24, 128  ;;  %p1461_p12 = scmp.lt.s32.totalorder %s43_s24, %s43_s24 }
  0x1b   :  { %p1457_p11 = scmp.ne.s32.totalorder %s43_s24, %s1456_s12  ;;  %p1462_p13 = scmp.lt.s32.totalorder %s1456_s12, %s1456_s12 }
  0x1d   :  { %p1463_p0 = por %p1462_p13, %p1461_p12 }
  0x1f   :  { %p1464_p1 = pnand %p1463_p0, %p1457_p11 }
  0x21   :  { %1467 = shalt.err (!%p1464_p1)
}
  0x22   :  { %45 = dma.hbm_to_vmem [thread:$0]  %s1881_s5, 128, %s43_s24, [#allocation8]  }
  0x23   :  { %1534 = dma.done.wait [#allocation5], 2048  }
  0x24   :  { %1535 = vsyncadd [#allocation5], 4294965248 }
  0x25   :  { %1536 = dma.done.wait [#allocation8], 128  }
  0x26   :  { %1537 = vsyncadd [#allocation8], 4294967168  ;;  %v1588_v0 = vmov 0   ;;  %v1674_v1 = vld [vmem:[%s1880_s4] sm:$0xff]  ;;  %v64_v7 = vlaneseq  ;;  %v1589_v13 = vmov 0.0   ;;  %p1199_p2 = scmp.le.s32.totalorder %s1876_s0, 1 }
  0x27   :  { %1407 = vset.pattern.permute.xlu0 %v1588_v0  ;;  %v1676_v2 = vld [vmem:[#allocation7] sm:$0xff]  ;;  %s1732_s24 = smov (!%p1199_p2), 1  }
  0x28   :  { %v1681_v3 = vld [vmem:[%s1882_s6] sm:$0xff]  ;;  %v1697_v8 = vshrl.u32 %v64_v7, 7 }
  0x29   :  { %v1686_v4 = vld [vmem:[%s1884_s8] sm:$0xff] }
  0x2a   :  { %v62_v5 = vld [vmem:[%s1883_s7] sm:$0xff]  ;;  %v1700_v9 = vsub.s32 0, %v1697_v8 }
  0x2b   :  { %79 = vperm.xlu0 %1407, %v62_v5   ;;  %v1694_v6 = vld [vmem:[%s1879_s3] sm:$0x1] }
  0x2c   :  { %vm76_vm0 = vcmp.gt.f32.partialorder %v1694_v6, 0.0  ;;  %v66_v10 = vld [vmem:[%s1878_s2] sm:$0x1]  }
  0x2d   :  { %v72_v11 = vrot.slane %v66_v10, %v1700_v9  ;;  %v1707_v12 = vld [vmem:[#allocation4] sm:$0xff]  ;;  %v1886_v32 = vmov %v66_v10 }
  0x2f   :  { %vm73_vm1 = vcmp.eq.s32.totalorder %v72_v11, %v1697_v8 }
  0x30   :  { %v1198_v14 = vsel %vm73_vm1, 1.0, %v1589_v13  }
  0x31   :  { %v89_v15 = vmul.f32 %v1198_v14, %v1707_v12 }
  0x33   :  { %v90_v16 = vrot.slane %v89_v15, 4 }
  0x35   :  { %v91_v17 = vadd.f32 %v90_v16, %v89_v15 }
  0x37   :  { %v92_v18 = vrot.slane %v91_v17, 2 }
  0x39   :  { %v93_v19 = vadd.f32 %v92_v18, %v91_v17 }
  0x3b   :  { %v94_v22 = vrot.slane %v93_v19, 1 }
  0x3d   :  { %v95_v25 = vadd.f32 %v94_v22, %v93_v19 }
  0x3f   :  { %v96_v28 = vmul.f32 %v95_v25, %v1694_v6 }
  0xaa   :  { %v1711_v20 = vpop.permute.xlu0 %79 }
  0xab   :  { %v82_v21 = vmul.f32 %v1198_v14, %v1711_v20 }
  0xad   :  { %v83_v23 = vrot.slane %v82_v21, 4 }
  0xaf   :  { %v84_v24 = vadd.f32 %v83_v23, %v82_v21 }
  0xb1   :  { %v85_v26 = vrot.slane %v84_v24, 2 }
  0xb3   :  { %v86_v27 = vadd.f32 %v85_v26, %v84_v24 }
  0xb5   :  { %v87_v29 = vrot.slane %v86_v27, 1  ;;  %1178 = sbr.rel (%p1199_p2) target bundleno = 451 (0x1c3), region = 73 }
  0xb7   :  { %v88_v30 = vadd.f32 %v87_v29, %v86_v27 }
  0xb9   :  { %v97_v31 = vadd.f32 %v96_v28, %v88_v30  }
  0xbb   :  { %v1887_v33 = vmov %v97_v31 }
  0xbc LB: > { %vm128_vm2 = vcmask 64512   ;;  %v1590_v34 = vmov 0.0   ;;  %vm1591_vm3 = vmmov 0   ;;  %v133_v36 = vand.u32 4294901760, %v1546_v14  ;;  %s109_s27 = scalar_lea.vmem %s1879_s3, %s1554_s24  ;;  %s107_s30 = scalar_lea.vmem %s1878_s2, %s1554_s24  ;;  %s1554_s24 = sphi %s1732_s24, %s101_s24   ;;  %v1550_v31 = vphi %v97_v31, %v1889_v31   ;;  %v1546_v14 = vphi %v1198_v14, %v1200_v14   ;;  %v1542_v10 = vphi %v66_v10, %v1888_v10  }
  0xbd   : > { %1244 = vmatprep.subr.mxu0 %v1590_v34  ;;  %1246 = vmatprep.mubr.msk.f32.mxu0 %vm1591_vm3, %v1590_v34  ;;  %v130_v35 = vsel %vm128_vm2, %v1674_v1, 0  ;;  %v110_v46 = vld [vmem:[%s109_s27] sm:$0x1]  ;;  %s1201_s11 = sshll.u32 %s1554_s24, 3  ;;  %s101_s24 = sadd.s32 1, %s1554_s24  }
  0xbe   : > { %v198_v37 = vand.u32 4294901760, %v130_v35  ;;  %1229 = vmatprep.subr.mxu1 %v1590_v34  ;;  %1231 = vmatprep.mubr.msk.f32.mxu1 %vm1591_vm3, %v1590_v34  ;;  %v210_v38 = vsub.f32 %v1546_v14, %v133_v36  ;;  %v108_v47 = vld [vmem:[%s107_s30] sm:$0x1]  ;;  %vm588_vm4 = vcmp.gt.f32.partialorder %v110_v46, 0.0  ;;  %s119_s12 = scalar_lea.vmem [#allocation4], %s1201_s11  ;;  %p100_p3 = scmp.ge.s32.totalorder %s101_s24, %s1876_s0 }
  0xbf   : > { %1245 = vmatpush3.msra.mxu0 %v133_v36  ;;  %1230 = vmatpush3.msra.mxu1 %v133_v36  ;;  %v589_v48 = vsel %vm588_vm4, %v108_v47, %v1542_v10   ;;  %v114_v49 = vrot.slane %v108_v47, %v1700_v9  ;;  %v120_v50 = vld [vmem:[%s119_s12] sm:$0xff] }
  0xc0   : > { %v199_v39 = vsub.f32 %v130_v35, %v198_v37  ;;  %1234 = vmatprep.subr.mxu1 %v1590_v34  ;;  %1249 = vmatprep.subr.mxu0 %v1590_v34  ;;  %v211_v41 = vand.u32 4294901760, %v210_v38  ;;  %v1890_v32 = vmov (%p100_p3), %v589_v48 }
  0xc1   : > { %vm115_vm5 = vcmp.eq.s32.totalorder %v114_v49, %v1697_v8 }
  0xc2   : > { %v200_v40 = vand.u32 4294901760, %v199_v39  ;;  %v212_v43 = vsub.f32 %v210_v38, %v211_v41  ;;  %v1200_v14 = vsel %vm115_vm5, 1.0, %v1590_v34  }
  0xc3   : > { %v121_v51 = vmul.f32 %v1200_v14, %v120_v50 }
  0xc4   : > { %1247 = vmatmul.mubr.f32.vlgmr.msra.gmra.mrb[0].mxu0 %v200_v40  ;;  %v201_v42 = vsub.f32 %v199_v39, %v200_v40  ;;  %v213_v45 = vand.u32 4294901760, %v212_v43 }
  0xc5   : > { %1250 = vmatpush3.msra.mxu0 %v211_v41  ;;  %1251 = vmatprep.mubr.msk.f32.mxu0 %vm1591_vm3, %v1590_v34  ;;  %v122_v52 = vrot.slane %v121_v51, 4 }
  0xc6   : > { %v202_v44 = vand.u32 4294901760, %v201_v42  ;;  %1254 = vmatprep.subr.mxu0 %v1590_v34 }
  0xc7   : > { %v123_v55 = vadd.f32 %v122_v52, %v121_v51 }
  0xc8   : > { %1232 = vmatmul.mubr.f32.vlgmr.msra.gmra.mrb[0].mxu1 %v202_v44 }
  0xc9   : > { %1235 = vmatpush3.msra.mxu1 %v213_v45  ;;  %1236 = vmatprep.mubr.msk.f32.mxu1 %vm1591_vm3, %v1590_v34  ;;  %v124_v57 = vrot.slane %v123_v55, 2 }
  0xca   : > { %1239 = vmatprep.subr.mxu1 %v1590_v34 }
  0xcb   : > { %v125_v61 = vadd.f32 %v124_v57, %v123_v55 }
  0xcc   : > { %1252 = vmatmul.mubr.f32.vlgmr.msra.gmra.mrb[0].mxu0 %v198_v37 }
  0xcd   : > { %1255 = vmatpush3.msra.mxu0 %v133_v36  ;;  %1256 = vmatprep.mubr.msk.f32.mxu0 %vm1591_vm3, %v1590_v34  ;;  %v126_v5 = vrot.slane %v125_v61, 1 }
  0xcf   : > { %v127_v11 = vadd.f32 %v126_v5, %v125_v61 }
  0xd0   : > { %1237 = vmatmul.mubr.f32.vlgmr.msra.gmra.mrb[0].mxu1 %v198_v37 }
  0xd1   : > { %1240 = vmatpush3.msra.mxu1 %v210_v38  ;;  %1241 = vmatprep.mubr.msk.f32.mxu1 %vm1591_vm3, %v1590_v34 }
  0xd4   : > { %1257 = vmatmul.mubr.f32.vlgmr.msra.gmra.mrb[0].mxu0 %v198_v37 }
  0xd8   : > { %1242 = vmatmul.mubr.f32.vlgmr.msra.gmra.mrb[0].mxu1 %v199_v39 }
 0x1a7   : > { %v574_v53 = vpop.f32.mrb[0].mxu0 }
 0x1a8   : > { %v1258_v54 = vpop.f32.mrb[1].mxu0 }
 0x1ab   : > { %v354_v56 = vpop.f32.mrb[0].mxu1 }
 0x1ac   : > { %v1289_v58 = vadd.f32 %v574_v53, %v354_v56  ;;  %v1243_v59 = vpop.f32.mrb[1].mxu1 }
 0x1ae   : > { %v578_v60 = vmul.f32 %v1289_v58, %v1200_v14 }
 0x1b0   : > { %v579_v62 = vrot.slane %v578_v60, 4 }
 0x1b2   : > { %v580_v63 = vadd.f32 %v579_v62, %v578_v60 }
 0x1b4   : > { %v581_v7 = vrot.slane %v580_v63, 2 }
 0x1b6   : > { %v582_v10 = vadd.f32 %v581_v7, %v580_v63 }
 0x1b8   : > { %v583_v15 = vrot.slane %v582_v10, 1 }
 0x1ba   : > { %v584_v16 = vadd.f32 %v583_v15, %v582_v10  ;;  %v1888_v10 = vmov %v589_v48 }
 0x1bc   : > { %v585_v17 = vadd.f32 %v584_v16, %v127_v11  ;;  %103 = sbr.rel (!%p100_p3) target bundleno = 188 (0xbc), region = 79 }
 0x1be   : > { %v586_v18 = vmul.f32 %v585_v17, %v110_v46 }
 0x1c0   : > { %v587_v19 = vadd.f32 %v1550_v31, %v586_v18  }
 0x1c2   : > { %v1889_v31 = vmov %v587_v19  ;;  %v1891_v33 = vmov (%p100_p3), %v587_v19 }
 0x1c3 PF:  { %1408 = vset.pattern.permute.xlu0 %v1588_v0  ;;  %v609_v21 = vadd.f32 %v1711_v20, %v1707_v12  ;;  %v593_v29 = vrot.slane %v1558_v32, %v1700_v9  ;;  %s1805_s14 = smov (!%p1199_p2), 1   ;;  %v1562_v33 = vphi %v1887_v33, %v1891_v33   ;;  %v1558_v32 = vphi %v1886_v32, %v1890_v32  }
 0x1c4   :  { %599 = vperm.xlu0 %1408, %v1686_v4  }
 0x1c5   :  { %v610_v22 = vrot.slane %v609_v21, 4  ;;  %vm594_vm6 = vcmp.eq.s32.totalorder %v593_v29, %v1697_v8 }
 0x1c6   :  { %v1202_v0 = vsel %vm594_vm6, 1.0, %v1589_v13 }
 0x1c7   :  { %v611_v23 = vmax.f32 %v609_v21, %v610_v22 }
 0x1c9   :  { %v612_v1 = vrot.slane %v611_v23, 2 }
 0x1cb   :  { %v613_v14 = vmax.f32 %v611_v23, %v612_v1 }
 0x1cd   :  { %v614_v24 = vrot.slane %v613_v14, 1 }
 0x1cf   :  { %v615_v25 = vmax.f32 %v613_v14, %v614_v24  }
 0x1d1   :  { %v616_v26 = vsub.f32 %v609_v21, %v615_v25  ;;  %v1892_v37 = vmov %v615_v25 }
 0x1d3   :  { %v617_v27 = vmul.f32 1.442695, %v616_v26 }
 0x1d5   :  { %1409 = vpow2.f32 %v617_v27 }
 0x1df   :  { %v1410_v28 = vpop.eup %1409  }
 0x1e0   :  { %v1893_v38 = vmov %v1410_v28 }
 0x243   :  { %v1788_v30 = vpop.permute.xlu0 %599 }
 0x244   :  { %v602_v4 = vmul.f32 %v1202_v0, %v1788_v30 }
 0x246   :  { %v603_v12 = vrot.slane %v602_v4, 4 }
 0x248   :  { %v604_v20 = vadd.f32 %v603_v12, %v602_v4 }
 0x24a   :  { %v605_v31 = vrot.slane %v604_v20, 2  ;;  %1191 = sbr.rel (%p1199_p2) target bundleno = 879 (0x36f), region = 84 }
 0x24c   :  { %v606_v34 = vadd.f32 %v605_v31, %v604_v20 }
 0x24e   :  { %v607_v35 = vrot.slane %v606_v34, 1 }
 0x250   :  { %v1791_v36 = vadd.f32 %v607_v35, %v606_v34 }
 0x251 LB: > { %vm647_vm7 = vcmask 64512   ;;  %v1592_v8 = vmov 0.0   ;;  %vm1593_vm8 = vmmov 0   ;;  %v652_v32 = vand.u32 4294901760, %v1570_v28  ;;  %s627_s5 = scalar_lea.vmem %s1879_s3, %s1574_s14  ;;  %s1204_s17 = sshll.u32 %s1574_s14, 3  ;;  %s1574_s14 = sphi %s1805_s14, %s622_s14   ;;  %v1570_v28 = vphi %v1410_v28, %v1895_v28   ;;  %v1566_v25 = vphi %v615_v25, %v1894_v25  }
 0x252   : > { %1274 = vmatprep.subr.mxu0 %v1592_v8  ;;  %1276 = vmatprep.mubr.msk.f32.mxu0 %vm1593_vm8, %v1592_v8  ;;  %v649_v13 = vsel %vm647_vm7, %v1676_v2, 0  ;;  %v1594_v40 = vmov 0   ;;  %v1824_v41 = vld [vmem:[%s627_s5] sm:$0x1]  ;;  %s630_s18 = scalar_lea.vmem [#allocation4], %s1204_s17  ;;  %s622_s14 = sadd.s32 1, %s1574_s14  }
 0x253   : > { %v717_v39 = vand.u32 4294901760, %v649_v13  ;;  %1259 = vmatprep.subr.mxu1 %v1592_v8  ;;  %1261 = vmatprep.mubr.msk.f32.mxu1 %vm1593_vm8, %v1592_v8  ;;  %v729_v42 = vsub.f32 %v1570_v28, %v652_v32  ;;  %vm1111_vm9 = vcmp.gt.f32.partialorder %v1824_v41, 0.0  ;;  %v631_v52 = vld [vmem:[%s630_s18] sm:$0xff]  ;;  %p621_p4 = scmp.ge.s32.totalorder %s622_s14, %s1876_s0 }
 0x254   : > { %1411 = vset.pattern.permute.xlu0 %v1594_v40  ;;  %1275 = vmatpush3.msra.mxu0 %v652_v32  ;;  %v1112_v44 = vsel %vm1111_vm9, 1, %v1594_v40 }
 0x255   : > { %v718_v43 = vsub.f32 %v649_v13, %v717_v39  ;;  %1260 = vmatpush3.msra.mxu1 %v652_v32  ;;  %1279 = vmatprep.subr.mxu0 %v1592_v8  ;;  %v730_v46 = vand.u32 4294901760, %v729_v42  ;;  %v1116_v1 = vrot.slane %v1112_v44, %v1700_v9 }
 0x256   : > { %1264 = vmatprep.subr.mxu1 %v1592_v8  ;;  %634 = vperm.xlu0 %1411, %v1681_v3  }
 0x257   : > { %v719_v45 = vand.u32 4294901760, %v718_v43  ;;  %v731_v48 = vsub.f32 %v729_v42, %v730_v46  ;;  %vm1117_vm10 = vcmp.eq.s32.totalorder %v1116_v1, 1 }
 0x259   : > { %1277 = vmatmul.mubr.f32.vlgmr.msra.gmra.mrb[0].mxu0 %v719_v45  ;;  %v720_v47 = vsub.f32 %v718_v43, %v719_v45  ;;  %v732_v50 = vand.u32 4294901760, %v731_v48 }
 0x25a   : > { %1280 = vmatpush3.msra.mxu0 %v730_v46  ;;  %1281 = vmatprep.mubr.msk.f32.mxu0 %vm1593_vm8, %v1592_v8 }
 0x25b   : > { %v721_v49 = vand.u32 4294901760, %v720_v47  ;;  %1284 = vmatprep.subr.mxu0 %v1592_v8 }
 0x25d   : > { %1262 = vmatmul.mubr.f32.vlgmr.msra.gmra.mrb[0].mxu1 %v721_v49 }
 0x25e   : > { %1265 = vmatpush3.msra.mxu1 %v732_v50  ;;  %1266 = vmatprep.mubr.msk.f32.mxu1 %vm1593_vm8, %v1592_v8 }
 0x25f   : > { %1269 = vmatprep.subr.mxu1 %v1592_v8 }
 0x261   : > { %1282 = vmatmul.mubr.f32.vlgmr.msra.gmra.mrb[0].mxu0 %v717_v39 }
 0x262   : > { %1285 = vmatpush3.msra.mxu0 %v652_v32  ;;  %1286 = vmatprep.mubr.msk.f32.mxu0 %vm1593_vm8, %v1592_v8 }
 0x265   : > { %1267 = vmatmul.mubr.f32.vlgmr.msra.gmra.mrb[0].mxu1 %v717_v39 }
 0x266   : > { %1270 = vmatpush3.msra.mxu1 %v729_v42  ;;  %1271 = vmatprep.mubr.msk.f32.mxu1 %vm1593_vm8, %v1592_v8 }
 0x269   : > { %1287 = vmatmul.mubr.f32.vlgmr.msra.gmra.mrb[0].mxu0 %v717_v39 }
 0x26d   : > { %1272 = vmatmul.mubr.f32.vlgmr.msra.gmra.mrb[0].mxu1 %v718_v43 }
 0x2d5   : > { %v635_v51 = vpop.permute.xlu0 %634 }
 0x2d6   : > { %v637_v53 = vadd.f32 %v635_v51, %v631_v52 }
 0x2d8   : > { %v638_v54 = vrot.slane %v637_v53, 4 }
 0x2da   : > { %v639_v55 = vmax.f32 %v637_v53, %v638_v54 }
 0x2dc   : > { %v640_v56 = vrot.slane %v639_v55, 2 }
 0x2de   : > { %v641_v57 = vmax.f32 %v639_v55, %v640_v56 }
 0x2e0   : > { %v642_v58 = vrot.slane %v641_v57, 1 }
 0x2e2   : > { %v643_v59 = vmax.f32 %v641_v57, %v642_v58 }
 0x2e4   : > { %v644_v60 = vsub.f32 %v637_v53, %v643_v59  ;;  %v1107_v29 = vadd.f32 %v1566_v25, %v643_v59 }
 0x2e6   : > { %v645_v61 = vmul.f32 1.442695, %v644_v60 }
 0x2e8   : > { %1412 = vpow2.f32 %v645_v61 }
 0x2f2   : > { %v1413_v11 = vpop.eup %1412 }
 0x33c   : > { %v1093_v62 = vpop.f32.mrb[0].mxu0 }
 0x33d   : > { %v1288_v63 = vpop.f32.mrb[1].mxu0 }
 0x340   : > { %v873_v5 = vpop.f32.mrb[0].mxu1 }
 0x341   : > { %v1298_v7 = vadd.f32 %v1093_v62, %v873_v5  ;;  %v1273_v10 = vpop.f32.mrb[1].mxu1 }
 0x343   : > { %v1097_v15 = vmul.f32 %v1413_v11, %v1298_v7 }
 0x345   : > { %v1098_v16 = vrot.slane %v1097_v15, 4 }
 0x347   : > { %v1099_v17 = vmax.f32 %v1097_v15, %v1098_v16 }
 0x349   : > { %v1100_v18 = vrot.slane %v1099_v17, 2 }
 0x34b   : > { %v1101_v19 = vmax.f32 %v1099_v17, %v1100_v18 }
 0x34d   : > { %v1102_v21 = vrot.slane %v1101_v19, 1 }
 0x34f   : > { %v1103_v22 = vmax.f32 %v1101_v19, %v1102_v21 }
 0x351   : > { %v1104_v23 = vmax.f32 %v1103_v22, 1e-30 }
 0x353   : > { %1414 = vrcp.f32 %v1104_v23 }
 0x35d   : > { %v1415_v14 = vpop.eup %1414 }
 0x35e   : > { %v1106_v24 = vmul.f32 %v1415_v14, %v1097_v15  ;;  %1416 = vlog2.f32 %v1415_v14 }
 0x360   : > { %v1118_v26 = vsel %vm1117_vm10, %v1106_v24, %v1570_v28  }
 0x361   : > { %v1895_v28 = vmov %v1118_v26  ;;  %v1897_v38 = vmov (%p621_p4), %v1118_v26 }
 0x368   : > { %v1417_v27 = vpop.eup %1416  ;;  %624 = sbr.rel (!%p621_p4) target bundleno = 593 (0x251), region = 90 }
 0x369   : > { %v1109_v0 = vmul.f32 0.6931472, %v1417_v27 }
 0x36b   : > { %v1110_v4 = vsub.f32 %v1107_v29, %v1109_v0 }
 0x36d   : > { %v1119_v12 = vsel %vm1111_vm9, %v1110_v4, %v1566_v25  }
 0x36e   : > { %v1894_v25 = vmov %v1119_v12  ;;  %v1896_v37 = vmov (%p621_p4), %v1119_v12 }
 0x36f PF:  { %1418 = vlog2.f32 %v1582_v38  ;;  %v1125_v28 = vrot.slane %v1578_v37, %v1700_v9  ;;  %s1595_s0 = smov [#allocation9]   ;;  %v1582_v38 = vphi %v1893_v38, %v1897_v38   ;;  %v1578_v37 = vphi %v1892_v37, %v1896_v37  }
 0x370   :  { %s1156_s3 = sshll.u32 %s1595_s0, 4  ;;  %s1157_s3 = int_to_ptr.vmem [resolvable:$true] %s1156_s3 }
 0x371   :  { %s1468_s4 = scalar_lea.vmem %s1157_s3, 16  ;;  %s1472_s6 = scalar_lea.vmem %s1157_s3, 32 }
 0x372   :  { %p1469_p5 = scmp.ne.s32.totalorder %s1157_s3, %s1468_s4  ;;  %p1473_p6 = scmp.lt.s32.totalorder %s1157_s3, %s1157_s3 }
 0x373   :  { %p1474_p7 = scmp.lt.s32.totalorder %s1472_s6, %s1468_s4 }
 0x375   :  { %p1475_p8 = por %p1474_p7, %p1473_p6 }
 0x377   :  { %p1476_p9 = pnand %p1475_p8, %p1469_p5 }
 0x379   :  { %v1419_v20 = vpop.eup %1418 }
 0x37a   :  { %v1121_v31 = vmul.f32 0.6931472, %v1419_v20 }
 0x37c   :  { %v1126_v34 = vadd.f32 %v1125_v28, %v1121_v31 }
 0x37e   :  { %v1127_v35 = vadd.f32 %v1126_v34, %v1788_v30  ;;  %v1146_v30 = vadd.f32 %v1562_v33, %v1791_v36 }
 0x380   :  { %v1128_v8 = vrot.slane %v1127_v35, 4 }
 0x382   :  { %v1129_v13 = vmax.f32 %v1127_v35, %v1128_v8 }
 0x384   :  { %v1130_v2 = vrot.slane %v1129_v13, 2 }
 0x386   :  { %v1131_v3 = vmax.f32 %v1129_v13, %v1130_v2 }
 0x388   :  { %v1132_v25 = vrot.slane %v1131_v3, 1 }
 0x38a   :  { %v1133_v32 = vmax.f32 %v1131_v3, %v1132_v25 }
 0x38c   :  { %v1134_v39 = vsub.f32 %v1127_v35, %v1133_v32 }
 0x38e   :  { %v1135_v40 = vmul.f32 1.442695, %v1134_v39 }
 0x390   :  { %1420 = vpow2.f32 %v1135_v40 }
 0x39a   :  { %v1421_v41 = vpop.eup %1420 }
 0x39b   :  { %v1137_v42 = vrot.slane %v1421_v41, 4 }
 0x39d   :  { %v1138_v43 = vadd.f32 %v1421_v41, %v1137_v42 }
 0x39f   :  { %v1139_v38 = vrot.slane %v1138_v43, 2 }
 0x3a1   :  { %v1140_v44 = vadd.f32 %v1139_v38, %v1138_v43 }
 0x3a3   :  { %v1141_v9 = vrot.slane %v1140_v44, 1 }
 0x3a5   :  { %v1142_v37 = vadd.f32 %v1141_v9, %v1140_v44 }
 0x3a7   :  { %1422 = vlog2.f32 %v1142_v37 }
 0x3b1   :  { %v1423_v45 = vpop.eup %1422 }
 0x3b2   :  { %v1144_v46 = vmul.f32 0.6931472, %v1423_v45 }
 0x3b4   :  { %v1145_v47 = vadd.f32 %v1144_v46, %v1133_v32 }
 0x3b6   :  { %v1147_v48 = vsub.f32 %v1146_v30, %v1145_v47 }
 0x3b8   :  { %v1148_v49 = vsel %vm76_vm0, %v1147_v48, 0.0 }
 0x3b9   :  { %1149 = vst [vmem:[#allocation9] sm:$0x1] %v1148_v49 }
 0x3ba   :  { %1479 = shalt.err (!%p1476_p9)
}
 0x3bb   :  { %s1480_s21 = scalar_lea.hbm %s1885_s9, 16 }
 0x3bc   :  { %p1481_p10 = scmp.ne.s32.totalorder %s1885_s9, %s1480_s21  ;;  %p1484_p11 = scmp.lt.u32.totalorder %s1480_s21, %s1885_s9 }
 0x3be   :  { %p1486_p12 = pnand %p1484_p11, %p1481_p10 }
 0x3c0   :  { %1489 = shalt.err (!%p1486_p12)
}
 0x3c1   :  { %1159 = dma.vmem_to_hbm [thread:$0]  %s1157_s3, 16, %s1885_s9, [#allocation6]  }
 0x3c2   :  { %1538 = dma.done.wait [#allocation6], 16  }
 0x3c3   :  { %1539 = vsyncadd [#allocation6], 4294967280 }
 0x3c4   :  { %1163 = vsyncpa [#allocation5], 1 }
 0x3c5   :  { %1164 = vsyncpa [#allocation8], 1 }
 0x3c6   :  { %1165 = vsyncpa [#allocation6], 1 }

</bundles_post_ra>
